<compile_context>
chip_gen: v7x
topology: tpu7x:2x2x1
jax: 0.10.0
libtpu: 0.0.40
codegen_flags: <defaults>
</compile_context>

<pallas_src>
import jax
import jax.numpy as jnp
from jax.experimental import pallas as pl
from jax.experimental.pallas import tpu as pltpu

BN_EPS = 1e-5
NEG_SLOPE = 0.01  # torch.nn.LeakyReLU default negative_slope


def _round_up(x: int, m: int) -> int:
    return ((x + m - 1) // m) * m


def _choose_tile_n(n: int, max_tile: int = 2048) -> int:
    """Largest tile <= max_tile rows that still yields >= 2 grid tiles (v7x megacore)."""
    if n <= 8:
        return 8
    half_tile = _round_up(-(-n // 2), 8)   # smallest multiple-of-8 tile giving 2 tiles
    return min(max_tile, half_tile)


def residual_linear_block2_kernel(
    x_ref,       # (TILE_N, F)  input tile
    scale0_ref,  # (1, F)       layer-0 folded BN scale  = gamma0 * rsqrt(var0 + eps)
    shift0_ref,  # (1, F)       layer-0 folded BN shift  = beta0 - mean0 * scale0
    wT_ref,      # (L, F, F)    bf16 weights, (in, out), later-layer BN scales folded in
    add_ref,     # (L, 1, F)    f32 post-matmul add = b_i*scale_{i+1} + shift_{i+1} (last: b)
    o_ref,       # (TILE_N, F)
):
    x = x_ref[...].astype(jnp.float32)
    # Layer-0 folded eval-mode BatchNorm (the only explicit BN; later BNs were
    # folded into the previous layer's weights/bias wrapper-side).
    h = x * scale0_ref[...] + shift0_ref[...]
    n_layers = wT_ref.shape[0]
    for i in range(n_layers):                        # static unroll over layers
        # Dropout(p=0.0) is the identity -> no-op.
        act = jnp.maximum(h, NEG_SLOPE * h)          # LeakyReLU(0.01), 2 VALU ops
        h = jnp.dot(act.astype(wT_ref.dtype), wT_ref[i],
                    preferred_element_type=jnp.float32) + add_ref[i]
    o_ref[...] = (h + x).astype(o_ref.dtype)         # residual add


def residual_linear_block2(x, gammas, betas, means, variances, wT, biases,
                           *, tile_n: int | None = None):
    """Fused residual block: N-tiled grid, resident bf16 weights, f32 elementwise."""
    N, F = x.shape
    L = gammas.shape[0]

    # --- wrapper-side, one-time parameter preprocessing (all in f32) --------
    scale = (gammas * jax.lax.rsqrt(variances + BN_EPS)).astype(jnp.float32)  # (L,1,F)
    shift = (betas - means * scale).astype(jnp.float32)                       # (L,1,F)

    # Fold layer i+1's BN (i = 0..L-2) into layer i's weights/bias:
    #   W'_i  = W_i * scale_{i+1}   (scale over output columns)
    #   add_i = b_i * scale_{i+1} + shift_{i+1}
    # Last layer keeps its plain bias (no BN follows it).
    col_scale = jnp.concatenate([scale[1:], jnp.ones_like(scale[:1])], axis=0)   # (L,1,F)
    post_shift = jnp.concatenate([shift[1:], jnp.zeros_like(shift[:1])], axis=0)  # (L,1,F)
    w_folded_f32 = wT.astype(jnp.float32) * col_scale                              # (L,F,F)
    add_vec = (biases.astype(jnp.float32) * col_scale + post_shift)                # (L,1,F)
    w_bf16 = w_folded_f32.astype(jnp.bfloat16)   # cast AFTER the f32 fold
    scale0 = scale[0]                            # (1,F)
    shift0 = shift[0]                            # (1,F)

    # --- batch tiling: big tiles, >=2 grid tiles, no pad/slice round-trips ---
    if tile_n is None:
        tile_n = _choose_tile_n(N)
    tile_n = max(8, _round_up(min(tile_n, _round_up(N, 8)), 8))
    grid = (pl.cdiv(N, tile_n),)

    # --- advisory cost estimate ---------------------------------------------
    itemsize = jnp.dtype(x.dtype).itemsize
    flops = 2 * L * N * F * F
    bytes_accessed = (2 * N * F * itemsize               # x in + o out
                      + w_bf16.size * 2                  # resident weights (bf16)
                      + (add_vec.size + scale0.size + shift0.size) * 4)
    cost = pl.CostEstimate(flops=flops, transcendentals=0,
                           bytes_accessed=int(bytes_accessed))

    out = pl.pallas_call(
        residual_linear_block2_kernel,
        out_shape=jax.ShapeDtypeStruct((N, F), x.dtype),
        grid=grid,
        in_specs=[
            pl.BlockSpec((tile_n, F), lambda i: (i, 0)),     # x: tiled over N
            pl.BlockSpec((1, F), lambda i: (0, 0)),          # layer-0 scale: resident
            pl.BlockSpec((1, F), lambda i: (0, 0)),          # layer-0 shift: resident
            pl.BlockSpec((L, F, F), lambda i: (0, 0, 0)),    # weights: resident
            pl.BlockSpec((L, 1, F), lambda i: (0, 0, 0)),    # add vectors: resident
        ],
        out_specs=pl.BlockSpec((tile_n, F), lambda i: (i, 0)),
        compiler_params=pltpu.CompilerParams(
            dimension_semantics=("parallel",),     # shard N-tiles across TCs (v7x)
            vmem_limit_bytes=32 * 1024 * 1024,     # few MiB needed; leaves v7x headroom
        ),
        cost_estimate=cost,
    )(x, scale0, shift0, w_bf16, add_vec)

    return out


def reference_forward(x, gammas, betas, means, variances, wT, biases):
    """Pure-JAX f32 reference identical to the PyTorch forward (eval-mode BN)."""
    h = x.astype(jnp.float32)
    x32 = h
    for i in range(gammas.shape[0]):
        inv_std = jax.lax.rsqrt(variances[i] + BN_EPS)
        bn = (h - means[i]) * inv_std * gammas[i] + betas[i]
        act = jnp.where(bn >= 0.0, bn, NEG_SLOPE * bn)
        h = act @ wT[i] + biases[i]
    return (h + x32).astype(x.dtype)


if __name__ == "__main__":
    # Lane-dense demo shapes: F = 128 (full lane width), N = 512 -> 2 grid tiles
    # (per the v7x guidance: for N=512 don't grow the tile past 256).
    batch = 512
    in_features = 128
    n_layers = 2

    key = jax.random.PRNGKey(0)
    kx, kg, kb, km, kv, kw, kbs = jax.random.split(key, 7)

    x = jax.random.normal(kx, (batch, in_features), dtype=jnp.float32)

    # Deterministic synthetic parameters (BN affine + running stats, Linear W/b).
    gammas = 1.0 + 0.1 * jax.random.normal(kg, (n_layers, 1, in_features), jnp.float32)
    betas = 0.1 * jax.random.normal(kb, (n_layers, 1, in_features), jnp.float32)
    means = 0.1 * jax.random.normal(km, (n_layers, 1, in_features), jnp.float32)
    variances = jnp.abs(
        1.0 + 0.1 * jax.random.normal(kv, (n_layers, 1, in_features), jnp.float32))
    # torch Linear weight is (out, in); we store its transpose (in, out) per layer.
    wT = jax.random.normal(kw, (n_layers, in_features, in_features), jnp.float32)
    wT = wT / jnp.sqrt(jnp.float32(in_features))
    biases = 0.1 * jax.random.normal(kbs, (n_layers, 1, in_features), jnp.float32)

    out = residual_linear_block2(x, gammas, betas, means, variances, wT, biases)
    out = jax.block_until_ready(out)

    ref = reference_forward(x, gammas, betas, means, variances, wT, biases)
    assert out.shape == x.shape and out.dtype == x.dtype
    # bf16 matmul operands (f32 accumulation) -> relaxed tolerance vs f32 reference.
    assert jnp.allclose(out, ref, atol=5e-2, rtol=5e-2), "mismatch vs reference"

    print("KERNEL_OK")
</pallas_src>

<mosaic_0001>
module attributes {stable_mosaic.version = 11 : i64} {
  func.func @residual_linear_block2_kernel(%arg0: i32, %arg1: memref<256x128xf32, #tpu.memory_space<vmem>>, %arg2: memref<1x128xf32, #tpu.memory_space<vmem>>, %arg3: memref<1x128xf32, #tpu.memory_space<vmem>>, %arg4: memref<2x128x128xbf16, #tpu.memory_space<vmem>>, %arg5: memref<2x1x128xf32, #tpu.memory_space<vmem>>, %arg6: memref<256x128xf32, #tpu.memory_space<vmem>>) attributes {dimension_semantics = [#tpu.dimension_semantics<parallel>], iteration_bounds = array<i64: 2>, scalar_prefetch = 0 : i64, scratch_operands = 0 : i64, tpu.core_type = #tpu.core_type<tc>, window_params = [{transform_indices = @transform_0, window_bounds = array<i64: 256, 128>}, {pipeline_mode = #tpu.pipeline_mode<synchronous>, transform_indices = @transform_1, window_bounds = array<i64: 1, 128>}, {pipeline_mode = #tpu.pipeline_mode<synchronous>, transform_indices = @transform_2, window_bounds = array<i64: 1, 128>}, {pipeline_mode = #tpu.pipeline_mode<synchronous>, transform_indices = @transform_3, window_bounds = array<i64: 2, 128, 128>}, {pipeline_mode = #tpu.pipeline_mode<synchronous>, transform_indices = @transform_4, window_bounds = array<i64: 2, 1, 128>}, {transform_indices = @transform_5, window_bounds = array<i64: 256, 128>}]} {
    %c0 = arith.constant 0 : index
    %c0_0 = arith.constant 0 : index
    %0 = vector.load %arg1[%c0, %c0_0] : memref<256x128xf32, #tpu.memory_space<vmem>>, vector<256x128xf32>
    %c0_1 = arith.constant 0 : index
    %c0_2 = arith.constant 0 : index
    %1 = vector.load %arg2[%c0_1, %c0_2] : memref<1x128xf32, #tpu.memory_space<vmem>>, vector<1x128xf32>
    %2 = vector.broadcast %1 : vector<1x128xf32> to vector<256x128xf32>
    %3 = arith.mulf %0, %2 : vector<256x128xf32>
    %c0_3 = arith.constant 0 : index
    %c0_4 = arith.constant 0 : index
    %4 = vector.load %arg3[%c0_3, %c0_4] : memref<1x128xf32, #tpu.memory_space<vmem>>, vector<1x128xf32>
    %5 = vector.broadcast %4 : vector<1x128xf32> to vector<256x128xf32>
    %6 = arith.addf %3, %5 : vector<256x128xf32>
    %cst = arith.constant 0.00999999977 : f32
    %7 = vector.broadcast %cst : f32 to vector<256x128xf32>
    %8 = arith.mulf %7, %6 : vector<256x128xf32>
    %9 = arith.maximumf %6, %8 : vector<256x128xf32>
    %10 = arith.truncf %9 : vector<256x128xf32> to vector<256x128xbf16>
    %c0_5 = arith.constant 0 : index
    %c0_6 = arith.constant 0 : index
    %c0_7 = arith.constant 0 : index
    %11 = vector.load %arg4[%c0_5, %c0_6, %c0_7] : memref<2x128x128xbf16, #tpu.memory_space<vmem>>, vector<1x128x128xbf16>
    %12 = vector.shape_cast %11 : vector<1x128x128xbf16> to vector<128x128xbf16>
    %cst_8 = arith.constant dense<0.000000e+00> : vector<256x128xf32>
    %13 = tpu.matmul %10, %12, %cst_8 {dimension_numbers = #tpu.dot_dimension_numbers<[1], [0], [0], [1], [0, 0, 1, 1], [], []>} : vector<256x128xbf16>, vector<128x128xbf16>, vector<256x128xf32> -> vector<256x128xf32>
    %c0_9 = arith.constant 0 : index
    %c0_10 = arith.constant 0 : index
    %c0_11 = arith.constant 0 : index
    %14 = vector.load %arg5[%c0_9, %c0_10, %c0_11] : memref<2x1x128xf32, #tpu.memory_space<vmem>>, vector<1x1x128xf32>
    %15 = vector.shape_cast %14 : vector<1x1x128xf32> to vector<1x128xf32>
    %16 = vector.broadcast %15 : vector<1x128xf32> to vector<256x128xf32>
    %17 = arith.addf %13, %16 : vector<256x128xf32>
    %cst_12 = arith.constant 0.00999999977 : f32
    %18 = vector.broadcast %cst_12 : f32 to vector<256x128xf32>
    %19 = arith.mulf %18, %17 : vector<256x128xf32>
    %20 = arith.maximumf %17, %19 : vector<256x128xf32>
    %21 = arith.truncf %20 : vector<256x128xf32> to vector<256x128xbf16>
    %c1 = arith.constant 1 : index
    %c0_13 = arith.constant 0 : index
    %c0_14 = arith.constant 0 : index
    %22 = vector.load %arg4[%c1, %c0_13, %c0_14] : memref<2x128x128xbf16, #tpu.memory_space<vmem>>, vector<1x128x128xbf16>
    %23 = vector.shape_cast %22 : vector<1x128x128xbf16> to vector<128x128xbf16>
    %cst_15 = arith.constant dense<0.000000e+00> : vector<256x128xf32>
    %24 = tpu.matmul %21, %23, %cst_15 {dimension_numbers = #tpu.dot_dimension_numbers<[1], [0], [0], [1], [0, 0, 1, 1], [], []>} : vector<256x128xbf16>, vector<128x128xbf16>, vector<256x128xf32> -> vector<256x128xf32>
    %c1_16 = arith.constant 1 : index
    %c0_17 = arith.constant 0 : index
    %c0_18 = arith.constant 0 : index
    %25 = vector.load %arg5[%c1_16, %c0_17, %c0_18] : memref<2x1x128xf32, #tpu.memory_space<vmem>>, vector<1x1x128xf32>
    %26 = vector.shape_cast %25 : vector<1x1x128xf32> to vector<1x128xf32>
    %27 = vector.broadcast %26 : vector<1x128xf32> to vector<256x128xf32>
    %28 = arith.addf %24, %27 : vector<256x128xf32>
    %29 = arith.addf %28, %0 : vector<256x128xf32>
    %c0_19 = arith.constant 0 : index
    %c0_20 = arith.constant 0 : index
    %30 = vector.load %arg6[%c0_19, %c0_20] : memref<256x128xf32, #tpu.memory_space<vmem>>, vector<256x128xf32>
    tpu.vector_store %arg6[%c0_19, %c0_20], %29 {strides = array<i32>} : memref<256x128xf32, #tpu.memory_space<vmem>>, vector<256x128xf32>,
    return
  }
  func.func @transform_0(%arg0: i32) -> (i32, i32) {
    %c0_i32 = arith.constant 0 : i32
    %c0_i32_0 = arith.constant 0 : i32
    return %arg0, %c0_i32 : i32, i32
  }
  func.func @transform_1(%arg0: i32) -> (i32, i32) {
    %c0_i32 = arith.constant 0 : i32
    %c0_i32_0 = arith.constant 0 : i32
    %c0_i32_1 = arith.constant 0 : i32
    return %c0_i32, %c0_i32_0 : i32, i32
  }
  func.func @transform_2(%arg0: i32) -> (i32, i32) {
    %c0_i32 = arith.constant 0 : i32
    %c0_i32_0 = arith.constant 0 : i32
    %c0_i32_1 = arith.constant 0 : i32
    return %c0_i32, %c0_i32_0 : i32, i32
  }
  func.func @transform_3(%arg0: i32) -> (i32, i32, i32) {
    %c0_i32 = arith.constant 0 : i32
    %c0_i32_0 = arith.constant 0 : i32
    %c0_i32_1 = arith.constant 0 : i32
    %c0_i32_2 = arith.constant 0 : i32
    return %c0_i32, %c0_i32_0, %c0_i32_1 : i32, i32, i32
  }
  func.func @transform_4(%arg0: i32) -> (i32, i32, i32) {
    %c0_i32 = arith.constant 0 : i32
    %c0_i32_0 = arith.constant 0 : i32
    %c0_i32_1 = arith.constant 0 : i32
    %c0_i32_2 = arith.constant 0 : i32
    return %c0_i32, %c0_i32_0, %c0_i32_1 : i32, i32, i32
  }
  func.func @transform_5(%arg0: i32) -> (i32, i32) {
    %c0_i32 = arith.constant 0 : i32
    %c0_i32_0 = arith.constant 0 : i32
    return %arg0, %c0_i32 : i32, i32
  }
}

</mosaic_0001>

<bundles_post_ra>
// kernel: tpu_custom_call.1
= control target key start
LH: loop header
LB: loop body
LE: loop exit
PB: predicated region body
PF: predicated region fallthrough
CT: control target
= control target key end

     0   :  { %10 = vsyncpa [#allocation3], 0  ;;  %s2150_s0 = inlined_call_operand.hbm [shape: f32[512,128], index: 0, kind: input, shape index: {}]   ;;  %s2151_s1 = inlined_call_operand.vmem [shape: f32[1,128], index: 1, kind: input, shape index: {}]   ;;  %s2152_s2 = inlined_call_operand.vmem [shape: f32[1,128], index: 2, kind: input, shape index: {}]   ;;  %s2153_s3 = inlined_call_operand.hbm [shape: bf16[2,128,128], index: 3, kind: input, shape index: {}]   ;;  %s2154_s4 = inlined_call_operand.vmem [shape: f32[2,1,128], index: 4, kind: input, shape index: {}]   ;;  %s2155_s5 = inlined_call_operand.hbm [shape: f32[512,128], index: 5, kind: output, shape index: {}]  }
   0x1   :  { %12 = vsyncpa [#allocation3 + $0x1], 0 }
   0x2   :  { %13 = vsyncpa [#allocation6], 0 }
   0x3   :  { %14 = vsyncpa [#allocation4], 0 }
   0x4   :  { %16 = vsyncpa [#allocation4 + $0x1], 0  ;;  %s1589_s18 = smov 0   ;;  %s1591_s19 = smov 0  }
   0x5   :  { %s1593_s20 = smov 0   ;;  %s1595_s21 = smov 0  }
   0x6 LB: > { %s1610_s22 = sadd.s32 4294967295, %s1548_s21   ;;  %s1158_s23 = sadd.s32 4294967294, %s1548_s21   ;;  %s1548_s21 = sphi %s1595_s21, %s2175_s21   ;;  %s1544_s20 = sphi %s1593_s20, %s2174_s20   ;;  %s1540_s19 = sphi %s1591_s19, %s2173_s19   ;;  %s1536_s18 = sphi %s1589_s18, %s2172_s18  }
   0x7   : > { %p42_p0 = scmp.ne.s32.totalorder %s1540_s19, %s1536_s18  ;;  %p2156_p1 = scmp.eq.s32.totalorder %s1610_s22, 0 }
   0x8   : > { %p156_p3 = scmp.eq.s32.totalorder %s1158_s23, 1  ;;  %p1159_p5 = scmp.ge.s32.totalorder %s1548_s21, 1 }
   0x9   : > { %p1619_p4 = por %p2156_p1, %p42_p0  ;;  %p163_p7 = scmp.lt.s32.totalorder %s1548_s21, 3 }
   0xa   : > { %p1624_p6 = por %p156_p3, %p42_p0  ;;  %s1550_s27 = smov [#allocation5]  }
   0xb   : > { %s2159_s24 = scalar_select %p1619_p4, 1, 0 }
   0xc   : > { %s2160_s25 = scalar_select %p1624_p6, 1, 0 }
   0xd   : > { %p1629_p8 = pnand %p1159_p5, %p163_p7  ;;  %s181_s28 = sshll.u32 %s1550_s27, 4  ;;  %s1633_s28 = int_to_ptr.vmem [resolvable:$true] %s181_s28 }
   0xe   : > { %s1645_s30 = sadd.s32 1, %s1548_s21   ;;  %s29_s6 = sadd.s32 1, %s1544_s20 }
   0xf   : > { %s2161_s26 = scalar_select %p1629_p8, 1, 0 }
  0x10   : > { %p1349_p9 = pneg %p1629_p8  ;;  %s26_s7 = ssub.s32 %s1548_s21, %s1645_s30 }
  0x11   : > { %s1420_s10 = scalar_lea.hbm %s2153_s3, 2048 }
  0x12   : > { %p1640_p11 = pnand %p1349_p9, %p2156_p1  ;;  %p1421_p12 = scmp.ne.s32.totalorder %s2153_s3, %s1420_s10 }
  0x13   : > { %p1427_p5 = scmp.lt.u32.totalorder %s1420_s10, %s2153_s3 }
  0x14   : > { %p1422_p13 = pneg %p1640_p11 }
  0x16   : > { %p1423_p0 = pnand %p1422_p13, %p1421_p12 }
  0x18   : > { %p1424_p3 = pneg %p1423_p0 }
  0x1a   : > { %p1429_p7 = pnand %p1427_p5, %p1424_p3 }
  0x1c   : > { %1432 = shalt.err (!%p1429_p7)
}
  0x1d   : > { %s1433_s15 = scalar_lea.vmem %s1633_s28, 2048  ;;  %p1441_p2 = scmp.lt.s32.totalorder %s1633_s28, %s1633_s28 }
  0x1e   : > { %p1434_p9 = scmp.ne.s32.totalorder %s1633_s28, %s1433_s15  ;;  %p1442_p6 = scmp.lt.s32.totalorder %s1433_s15, %s1433_s15 }
  0x20   : > { %p1436_p10 = pnand %p1434_p9, %p1422_p13  ;;  %p1443_p4 = por %p1442_p6, %p1441_p2 }
  0x22   : > { %p1437_p1 = pneg %p1436_p10 }
  0x24   : > { %p1444_p8 = pnand %p1443_p4, %p1437_p1 }
  0x26   : > { %1447 = shalt.err (!%p1444_p8)
}
  0x27   : > { %s1551_s16 = smov 64   ;;  %s1552_s17 = smov 4  }
  0x28   : > { %1352 = dma.hbm_to_vmem [thread:$0]  (!%p1640_p11), %s2153_s3, 2048, %s1633_s28, [#allocation6], %s1551_s16, %s1551_s16, %s1552_s17  }
  0x29   : > { %p27_p2 = scmp.eq.s32.totalorder %s26_s7, 0  ;;  %p36_p1 = scmp.ne.s32.totalorder %s1544_s20, %s1540_s19 }
  0x2a   : > { %p37_p4 = scmp.eq.s32.totalorder %s1548_s21, 0  ;;  %p1362_p6 = scmp.lt.s32.totalorder %s1548_s21, 2 }
  0x2b   : > { %s1676_s8 = scalar_select %p27_p2, %s1544_s20, %s29_s6  }
  0x2c   : > { %p38_p8 = por %p37_p4, %p36_p1  ;;  %p2163_p10 = scmp.eq.s32.totalorder %s1610_s22, 1 }
  0x2d   : > { %s198_s10 = sand.u32 1, %s1544_s20   ;;  %s1195_s11 = sshll.u32 %s1548_s21, 12 }
  0x2e   : > { %p1680_p12 = por %p2163_p10, %p36_p1  ;;  %s1162_s12 = sshll.u32 %s198_s10, 8 }
  0x2f   : > { %s1689_s14 = scalar_lea.hbm %s2150_s0, %s1195_s11  ;;  %s202_s28 = scalar_lea.vmem [#allocation2], %s1162_s12 }
  0x30   : > { %s209_s6 = sshll.u32 %s202_s28, 4  ;;  %p1691_p11 = pnand %p1362_p6, %p38_p8  ;;  %s1695_s6 = int_to_ptr.vmem [resolvable:$true] %s209_s6 }
  0x31   : > { %s1697_s15 = scalar_lea.sflag [#allocation3], %s198_s10  ;;  %s1448_s16 = scalar_lea.hbm %s1689_s14, 4096 }
  0x32   : > { %p1449_p13 = scmp.ne.s32.totalorder %s1689_s14, %s1448_s16  ;;  %p1450_p0 = pneg %p1691_p11 }
  0x33   : > { %s1453_s27 = scalar_lea.hbm %s2150_s0, 8192  ;;  %p1454_p7 = scmp.lt.u32.totalorder %s1689_s14, %s2150_s0 }
  0x34   : > { %p1451_p3 = pnand %p1450_p0, %p1449_p13  ;;  %p1455_p9 = scmp.lt.u32.totalorder %s1453_s27, %s1448_s16 }
  0x35   : > { %p1457_p1 = scmp.lt.u32.totalorder %s1448_s16, %s1689_s14 }
  0x36   : > { %p1452_p5 = pneg %p1451_p3  ;;  %p1456_p2 = por %p1455_p9, %p1454_p7 }
  0x38   : > { %p1458_p4 = por %p1457_p1, %p1456_p2 }
  0x3a   : > { %p1459_p6 = pnand %p1458_p4, %p1452_p5 }
  0x3c   : > { %1462 = shalt.err (!%p1459_p6)
}
  0x3d   : > { %s1463_s10 = scalar_lea.vmem %s1695_s6, 4096  ;;  %s1553_s29 = smov [#allocation2]  }
  0x3e   : > { %p1464_p8 = scmp.ne.s32.totalorder %s1695_s6, %s1463_s10  ;;  %s1468_s13 = sshll.u32 %s1553_s29, 4  ;;  %s1469_s13 = int_to_ptr.vmem [resolvable:$false] %s1468_s13 }
  0x3f   : > { %s1470_s28 = scalar_lea.vmem %s1469_s13, 8192  ;;  %p1471_p3 = scmp.lt.s32.totalorder %s1695_s6, %s1469_s13 }
  0x40   : > { %p1466_p10 = pnand %p1464_p8, %p1450_p0  ;;  %p1472_p7 = scmp.lt.s32.totalorder %s1470_s28, %s1463_s10 }
  0x42   : > { %p1467_p13 = pneg %p1466_p10  ;;  %p1473_p9 = por %p1472_p7, %p1471_p3 }
  0x44   : > { %p1474_p2 = pnand %p1473_p9, %p1467_p13 }
  0x46   : > { %1477 = shalt.err (!%p1474_p2)
}
  0x47   : > { %s1554_s16 = smov 128   ;;  %s1555_s17 = smov 8  }
  0x48   : > { %1356 = dma.hbm_to_vmem [thread:$0]  (!%p1691_p11), %s1689_s14, 4096, %s1695_s6, %s1697_s15, %s1554_s16, %s1554_s16, %s1555_s17  }
  0x49   : > { %p2166_p0 = scmp.ne.s32.totalorder %s2161_s26, 0 }
  0x4a   : > { %s1728_s23 = sand.u32 (!%p2166_p0), 1, %s1540_s19   ;;  %p2167_p5 = scmp.ne.s32.totalorder (!%p2166_p0), %s2159_s24, 0 }
  0x4b   : > { %221 = sbr.rel (%p2166_p0) target bundleno = 633 (0x279), region = 40  ;;  %s1166_s27 = sshll.u32 (!%p2166_p0), %s1728_s23, 8 }
  0x4c   : > { %s224_s11 = scalar_lea.sflag (!%p2166_p0), [#allocation3], %s1728_s23  ;;  %s1734_s12 = scalar_lea.vmem (!%p2166_p0), [#allocation2], %s1166_s27 }
  0x52   : > { %1523 = dma.done.wait (%p2167_p5), %s224_s11, 4096  }
  0x53   : > { %1525 = vsyncadd (%p2167_p5), %s224_s11, 4294963200  ;;  %p2168_p11 = scmp.eq.s32.totalorder %s1610_s22, 0 }
  0x55   : > { %1527 = dma.done.wait (%p2168_p11), [#allocation6], 2048   ;;  %p2169_p1 = pmov %p2168_p11 }
  0x56   : > { %v1404_v0 = vld [vmem:[#allocation5] sm:$0xff]   ;;  %v1405_v1 = vld [vmem:[#allocation5 + $0x8] sm:$0xff]   ;;  %v1406_v2 = vld [vmem:[#allocation5 + $0x10] sm:$0xff]   ;;  %s2007_s13 = scalar_lea.vmem [#allocation7], %s1166_s27  ;;  %s1196_s28 = sshll.u32 %s1610_s22, 12 }
  0x57   : > { %1529 = vsyncadd (%p2169_p1), [#allocation6], 4294965248  ;;  %1245 = vmatprep.subr.bf16.mxu0 %v1404_v0  ;;  %v1407_v3 = vld [vmem:[#allocation5 + $0x18] sm:$0xff]   ;;  %v1745_v4 = vld [vmem:[%s1734_s12] sm:$0xff]  ;;  %s1075_s16 = sshll.u32 %s2007_s13, 4  ;;  %s2100_s11 = scalar_lea.hbm %s2155_s5, %s1196_s28  ;;  %s2102_s16 = int_to_ptr.vmem [resolvable:$true] %s1075_s16 }
  0x58   : > { %1246 = vmatpush3.bf16.msra.mxu0 %v1404_v0  ;;  %v1748_v5 = vld [vmem:[%s1734_s12 + $0x8] sm:$0xff]  ;;  %v1753_v6 = vld [vmem:[%s2151_s1] ss:$0 sm:$0xff]  ;;  %v1765_v10 = vld [vmem:[%s1734_s12 + $0x10] sm:$0xff]  ;;  %s1062_s22 = scalar_lea.sflag [#allocation4], %s1728_s23  ;;  %s1556_s24 = smov [#allocation7]  }
  0x59   : > { %1247 = vmatprep.subr.bf16.mxu0 %v1405_v1  ;;  %v300_v7 = vmul.f32 %v1753_v6, %v1745_v4  ;;  %v301_v8 = vmul.f32 %v1753_v6, %v1748_v5  ;;  %v1762_v9 = vld [vmem:[%s2152_s2] ss:$0 sm:$0xff]  ;;  %v1768_v11 = vld [vmem:[%s1734_s12 + $0x18] sm:$0xff]  ;;  %v302_v16 = vmul.f32 %v1753_v6, %v1765_v10  ;;  %v1778_v17 = vld [vmem:[%s1734_s12 + $0x28] sm:$0xff]  ;;  %s1482_s26 = sshll.u32 %s1556_s24, 4  ;;  %s1483_s26 = int_to_ptr.vmem [resolvable:$false] %s1482_s26 }
  0x5a   : > { %v1773_v14 = vld [vmem:[%s1734_s12 + $0x20] sm:$0xff]  ;;  %v303_v20 = vmul.f32 %v1753_v6, %v1768_v11  ;;  %v305_v24 = vmul.f32 %v1753_v6, %v1778_v17  ;;  %v1409_v25 = vld [vmem:[#allocation5 + $0x28] sm:$0xff]   ;;  %v1790_v30 = vld [vmem:[%s1734_s12 + $0x30] sm:$0xff]  ;;  %s1484_s14 = scalar_lea.vmem %s1483_s26, 8192  ;;  %p1485_p10 = scmp.lt.s32.totalorder %s2102_s16, %s1483_s26 }
  0x5b   : > { %v339_v12 = vadd.f32 %v1762_v9, %v300_v7  ;;  %v340_v13 = vadd.f32 %v1762_v9, %v301_v8  ;;  %v1408_v15 = vld [vmem:[#allocation5 + $0x20] sm:$0xff]   ;;  %v304_v21 = vmul.f32 %v1753_v6, %v1773_v14  ;;  %v341_v26 = vadd.f32 %v1762_v9, %v302_v16  ;;  %v1410_v31 = vld [vmem:[#allocation5 + $0x30] sm:$0xff]   ;;  %v1794_v33 = vld [vmem:[%s1734_s12 + $0x38] sm:$0xff] }
  0x5c   : > { %1248 = vmatpush3.bf16.msra.mxu0 %v1405_v1  ;;  %v342_v28 = vadd.f32 %v1762_v9, %v303_v20  ;;  %v344_v32 = vadd.f32 %v1762_v9, %v305_v24  ;;  %v1797_v35 = vld [vmem:[%s1734_s12 + $0x40] sm:$0xff]  ;;  %v1800_v36 = vld [vmem:[%s1734_s12 + $0x48] sm:$0xff]  ;;  %v306_v38 = vmul.f32 %v1753_v6, %v1790_v30  ;;  %v307_v42 = vmul.f32 %v1753_v6, %v1794_v33  ;;  %v1411_v46 = vld [vmem:[#allocation5 + $0x38] sm:$0xff]  }
  0x5d   : > { %1249 = vmatprep.subr.bf16.mxu0 %v1406_v2  ;;  %v371_v18 = vmul.f32 0.01, %v339_v12  ;;  %v372_v19 = vmul.f32 0.01, %v340_v13  ;;  %v343_v29 = vadd.f32 %v1762_v9, %v304_v21  ;;  %v373_v34 = vmul.f32 0.01, %v341_v26 }
  0x5e   : > { %v374_v37 = vmul.f32 0.01, %v342_v28  ;;  %v1412_v39 = vld [vmem:[#allocation5 + $0x40] sm:$0xff]   ;;  %v1413_v40 = vld [vmem:[#allocation5 + $0x48] sm:$0xff]   ;;  %v376_v43 = vmul.f32 0.01, %v344_v32  ;;  %v308_v44 = vmul.f32 %v1753_v6, %v1797_v35  ;;  %v309_v45 = vmul.f32 %v1753_v6, %v1800_v36 }
  0x5f   : > { %v403_v22 = vmax.f32 %v339_v12, %v371_v18  ;;  %v404_v23 = vmax.f32 %v340_v13, %v372_v19  ;;  %v375_v41 = vmul.f32 0.01, %v343_v29  ;;  %1293 = vmatprep.subr.bf16.mxu1 %v1412_v39  ;;  %v1811_v47 = vld [vmem:[%s1734_s12 + $0x50] sm:$0xff]  ;;  %v345_v48 = vadd.f32 %v1762_v9, %v306_v38  ;;  %v1815_v49 = vld [vmem:[%s1734_s12 + $0x58] sm:$0xff]  ;;  %v1818_v50 = vld [vmem:[%s1734_s12 + $0x60] sm:$0xff] }
  0x60   : > { %1250 = vmatpush3.bf16.msra.mxu0 %v1406_v2  ;;  %1294 = vmatpush3.bf16.msra.mxu1 %v1412_v39  ;;  %v405_v51 = vmax.f32 %v341_v26, %v373_v34  ;;  %v406_v52 = vmax.f32 %v342_v28, %v374_v37  ;;  %v346_v53 = vadd.f32 %v1762_v9, %v307_v42  ;;  %v1414_v54 = vld [vmem:[#allocation5 + $0x50] sm:$0xff]   ;;  %v1824_v59 = vld [vmem:[%s1734_s12 + $0x68] sm:$0xff]  ;;  %v1843_v20 = vld [vmem:[%s1734_s12 + $0x78] sm:$0xff] }
  0x61   : > { %1251 = vmatprep.subr.bf16.mxu0 %v1407_v3  ;;  %v435_v27 = vpack.c.bf16 %v404_v23, %v403_v22  ;;  %1295 = vmatprep.subr.bf16.mxu1 %v1413_v40  ;;  %v407_v55 = vmax.f32 %v343_v29, %v375_v41  ;;  %v408_v56 = vmax.f32 %v344_v32, %v376_v43  ;;  %v377_v60 = vmul.f32 0.01, %v345_v48  ;;  %v1835_v13 = vld [vmem:[%s1734_s12 + $0x70] sm:$0xff]  ;;  %v1416_v24 = vld [vmem:[#allocation5 + $0x60] sm:$0xff]   ;;  %v1860_v32 = vld [vmem:[%s1734_s12 + $0xe8] sm:$0xff] }
  0x62   : > { %v347_v57 = vadd.f32 %v1762_v9, %v308_v44  ;;  %v348_v58 = vadd.f32 %v1762_v9, %v309_v45  ;;  %v310_v61 = vmul.f32 %v1753_v6, %v1811_v47  ;;  %v311_v62 = vmul.f32 %v1753_v6, %v1815_v49  ;;  %v1852_v28 = vld [vmem:[%s1734_s12 + $0xe0] sm:$0xff]  ;;  %v1863_v34 = vld [vmem:[%s1734_s12 + $0xf0] sm:$0xff] }
  0x63   : > { %1261 = vmatprep.mubr.bf16.mxu0 %v435_v27  ;;  %v312_v63 = vmul.f32 %v1753_v6, %v1818_v50  ;;  %v436_v0 = vpack.c.bf16 %v406_v52, %v405_v51  ;;  %v378_v1 = vmul.f32 0.01, %v346_v53  ;;  %v313_v2 = vmul.f32 %v1753_v6, %v1824_v59  ;;  %v1849_v27 = vld [vmem:[%s1734_s12 + $0x80] sm:$0xff]  ;;  %v1878_v51 = vld [vmem:[%s1734_s12 + $0xf8] sm:$0xff] }
  0x64   : > { %1252 = vmatpush3.bf16.msra.mxu0 %v1407_v3  ;;  %1296 = vmatpush3.bf16.msra.mxu1 %v1413_v40  ;;  %v1415_v3 = vld [vmem:[#allocation5 + $0x58] sm:$0xff]   ;;  %v437_v7 = vpack.c.bf16 %v408_v56, %v407_v55  ;;  %v379_v8 = vmul.f32 0.01, %v347_v57  ;;  %v380_v12 = vmul.f32 0.01, %v348_v58  ;;  %v349_v16 = vadd.f32 %v1762_v9, %v310_v61  ;;  %v1887_v61 = vld [vmem:[%s1734_s12 + $0x90] sm:$0xff] }
  0x65   : > { %1253 = vmatprep.subr.bf16.mxu0 %v1408_v15  ;;  %1297 = vmatprep.subr.bf16.mxu1 %v1414_v54  ;;  %v350_v18 = vadd.f32 %v1762_v9, %v311_v62  ;;  %v1840_v19 = vadd.f32 %v1762_v9, %v312_v63  ;;  %v410_v21 = vmax.f32 %v346_v53, %v378_v1  ;;  %v1890_v62 = vld [vmem:[%s1734_s12 + $0x98] sm:$0xff] }
  0x66   : > { %v352_v22 = vadd.f32 %v1762_v9, %v313_v2  ;;  %v314_v23 = vmul.f32 %v1753_v6, %v1835_v13  ;;  %v412_v26 = vmax.f32 %v348_v58, %v380_v12  ;;  %v315_v29 = vmul.f32 %v1753_v6, %v1843_v20 }
  0x67   : > { %v381_v37 = vmul.f32 0.01, %v349_v16  ;;  %v382_v38 = vmul.f32 0.01, %v350_v18  ;;  %v383_v39 = vmul.f32 0.01, %v1840_v19  ;;  %v328_v43 = vmul.f32 %v1753_v6, %v1852_v28 }
  0x68   : > { %1254 = vmatpush3.bf16.msra.mxu0 %v1408_v15  ;;  %v409_v15 = vmax.f32 %v345_v48, %v377_v60  ;;  %1298 = vmatpush3.bf16.msra.mxu1 %v1414_v54  ;;  %v384_v41 = vmul.f32 0.01, %v352_v22  ;;  %v1867_v42 = vadd.f32 %v1762_v9, %v314_v23  ;;  %v316_v45 = vmul.f32 %v1753_v6, %v1849_v27 }
  0x69   : > { %1255 = vmatprep.subr.bf16.mxu0 %v1409_v25  ;;  %1299 = vmatprep.subr.bf16.mxu1 %v1415_v3  ;;  %v329_v48 = vmul.f32 %v1753_v6, %v1860_v32  ;;  %v354_v52 = vadd.f32 %v1762_v9, %v315_v29  ;;  %v367_v53 = vadd.f32 %v1762_v9, %v328_v43 }
  0x6a   : > { %v438_v40 = vpack.c.bf16 %v410_v21, %v409_v15  ;;  %v330_v54 = vmul.f32 %v1753_v6, %v1863_v34  ;;  %v413_v55 = vmax.f32 %v349_v16, %v381_v37  ;;  %v414_v56 = vmax.f32 %v350_v18, %v382_v38  ;;  %v1902_v16 = vld [vmem:[%s1734_s12 + $0xa8] sm:$0xff] }
  0x6b   : > { %v368_v58 = vadd.f32 %v1762_v9, %v329_v48  ;;  %v416_v60 = vmax.f32 %v352_v22, %v384_v41  ;;  %v399_v63 = vmul.f32 0.01, %v367_v53  ;;  %v385_v2 = vmul.f32 0.01, %v1867_v42 }
  0x6c   : > { %1256 = vmatpush3.bf16.msra.mxu0 %v1409_v25  ;;  %v411_v25 = vmax.f32 %v347_v57, %v379_v8  ;;  %1300 = vmatpush3.bf16.msra.mxu1 %v1415_v3  ;;  %v415_v57 = vmax.f32 %v1840_v19, %v383_v39  ;;  %v369_v1 = vadd.f32 %v1762_v9, %v330_v54  ;;  %v1899_v8 = vld [vmem:[%s1734_s12 + $0xa0] sm:$0xff]  ;;  %v386_v15 = vmul.f32 0.01, %v354_v52 }
  0x6d   : > { %1257 = vmatprep.subr.bf16.mxu0 %v1410_v31  ;;  %1301 = vmatprep.subr.bf16.mxu1 %v1416_v24  ;;  %v355_v3 = vadd.f32 %v1762_v9, %v316_v45  ;;  %v400_v12 = vmul.f32 0.01, %v368_v58  ;;  %v431_v18 = vmax.f32 %v367_v53, %v399_v63  ;;  %v440_v22 = vpack.c.bf16 %v414_v56, %v413_v55  ;;  %v1920_v55 = vld [vmem:[%s1734_s12 + $0xb0] sm:$0xff]  ;;  %v1924_v63 = vld [vmem:[%s1734_s12 + $0xb8] sm:$0xff] }
  0x6e   : > { %v439_v44 = vpack.c.bf16 %v412_v26, %v411_v25  ;;  %v401_v21 = vmul.f32 0.01, %v369_v1  ;;  %v318_v23 = vmul.f32 %v1753_v6, %v1887_v61  ;;  %v441_v26 = vpack.c.bf16 %v416_v60, %v415_v57 }
  0x6f   : > { %v432_v25 = vmax.f32 %v368_v58, %v400_v12  ;;  %v320_v29 = vmul.f32 %v1753_v6, %v1899_v8  ;;  %v387_v39 = vmul.f32 0.01, %v355_v3  ;;  %v321_v41 = vmul.f32 %v1753_v6, %v1902_v16 }
  0x70   : > { %1258 = vmatpush3.bf16.msra.mxu0 %v1410_v31  ;;  %v1857_v31 = vld [vmem:[%s1734_s12 + $0x88] sm:$0xff]  ;;  %1302 = vmatpush3.bf16.msra.mxu1 %v1416_v24  ;;  %v319_v24 = vmul.f32 %v1753_v6, %v1890_v62  ;;  %v433_v38 = vmax.f32 %v369_v1, %v401_v21  ;;  %v417_v45 = vmax.f32 %v1867_v42, %v385_v2 }
  0x71   : > { %1259 = vmatprep.subr.bf16.mxu0 %v1411_v46  ;;  %v1913_v43 = vpack.c.bf16 %v432_v25, %v431_v18  ;;  %v357_v48 = vadd.f32 %v1762_v9, %v318_v23  ;;  %v359_v54 = vadd.f32 %v1762_v9, %v320_v29  ;;  %v419_v57 = vmax.f32 %v355_v3, %v387_v39  ;;  %v1930_v42 = vld [vmem:[%s1734_s12 + $0xc8] sm:$0xff]  ;;  %v1945_v39 = vld [vmem:[%s1734_s12 + $0xd0] sm:$0xff] }
  0x72   : > { %v358_v53 = vadd.f32 %v1762_v9, %v319_v24  ;;  %v360_v60 = vadd.f32 %v1762_v9, %v321_v41  ;;  %v322_v1 = vmul.f32 %v1753_v6, %v1920_v55  ;;  %v323_v3 = vmul.f32 %v1753_v6, %v1924_v63 }
  0x73   : > { %v389_v2 = vmul.f32 0.01, %v357_v48  ;;  %v325_v21 = vmul.f32 %v1753_v6, %v1930_v42 }
  0x74   : > { %1260 = vmatpush3.bf16.msra.mxu0 %v1411_v46  ;;  %v317_v46 = vmul.f32 %v1753_v6, %v1857_v31  ;;  %v390_v12 = vmul.f32 0.01, %v358_v53  ;;  %v392_v18 = vmul.f32 0.01, %v360_v60  ;;  %v362_v25 = vadd.f32 %v1762_v9, %v323_v3 }
  0x75   : > { %v421_v23 = vmax.f32 %v357_v48, %v389_v2 }
  0x76   : > { %v422_v24 = vmax.f32 %v358_v53, %v390_v12  ;;  %v424_v29 = vmax.f32 %v360_v60, %v392_v18 }
  0x77   : > { %1262 = vmatmul.mubr.bf16.vlgmr.msra.gmra.mrb[0].mxu0 %v436_v0  ;;  %v331_v0 = vmul.f32 %v1753_v6, %v1878_v51 }
  0x78   : > { %1265 = vmatprep.mubr.bf16.mxu0 %v437_v7  ;;  %v356_v7 = vadd.f32 %v1762_v9, %v317_v46  ;;  %v418_v46 = vmax.f32 %v354_v52, %v386_v15  ;;  %v391_v15 = vmul.f32 0.01, %v359_v54 }
  0x79   : > { %v370_v19 = vadd.f32 %v1762_v9, %v331_v0  ;;  %v1927_v0 = vld [vmem:[%s1734_s12 + $0xc0] sm:$0xff] }
  0x7a   : > { %v442_v52 = vpack.c.bf16 %v418_v46, %v417_v45  ;;  %v394_v45 = vmul.f32 0.01, %v362_v25  ;;  %v326_v46 = vmul.f32 %v1753_v6, %v1945_v39 }
  0x7b   : > { %v402_v37 = vmul.f32 0.01, %v370_v19 }
  0x7c   : > { %v426_v60 = vmax.f32 %v362_v25, %v394_v45 }
  0x7f   : > { %1266 = vmatmul.mubr.bf16.gmra.mrb[4].mxu0 %v438_v40  ;;  %v388_v40 = vmul.f32 0.01, %v356_v7 }
  0x80   : > { %1269 = vmatprep.mubr.bf16.mxu0 %v439_v44  ;;  %v434_v44 = vmax.f32 %v370_v19, %v402_v37  ;;  %v324_v19 = vmul.f32 %v1753_v6, %v1927_v0 }
  0x81   : > { %v420_v58 = vmax.f32 %v356_v7, %v388_v40  ;;  %v1948_v40 = vld [vmem:[%s1734_s12 + $0xd8] sm:$0xff]  ;;  %s1478_s12 = scalar_lea.vmem %s2102_s16, 4096 }
  0x82   : > { %v450_v56 = vpack.c.bf16 %v434_v44, %v433_v38  ;;  %v363_v37 = vadd.f32 %v1762_v9, %v324_v19  ;;  %v364_v38 = vadd.f32 %v1762_v9, %v325_v21  ;;  %v444_v44 = vpack.c.bf16 %v422_v24, %v421_v23  ;;  %v1419_v23 = vld [vmem:[#allocation5 + $0x78] sm:$0xff]   ;;  %v1960_v24 = vld [vmem:[%s2154_s4] ss:$0 sm:$0xff]  ;;  %p1479_p4 = scmp.ne.s32.totalorder %s2102_s16, %s1478_s12  ;;  %p1486_p13 = scmp.lt.s32.totalorder %s1484_s14, %s1478_s12 }
  0x83   : > { %v443_v7 = vpack.c.bf16 %v420_v58, %v419_v57  ;;  %v327_v48 = vmul.f32 %v1753_v6, %v1948_v40 }
  0x84   : > { %v396_v57 = vmul.f32 0.01, %v364_v38  ;;  %p1480_p6 = pnand %p1479_p4, %p1680_p12  ;;  %p1487_p3 = por %p1486_p13, %p1485_p10 }
  0x86   : > { %v428_v12 = vmax.f32 %v364_v38, %v396_v57  ;;  %p1481_p8 = pneg %p1480_p6 }
  0x87   : > { %1270 = vmatmul.mubr.bf16.gmra.mrb[8].mxu0 %v440_v22  ;;  %v361_v22 = vadd.f32 %v1762_v9, %v322_v1  ;;  %v366_v1 = vadd.f32 %v1762_v9, %v327_v48 }
  0x88   : > { %1273 = vmatprep.mubr.bf16.mxu0 %v441_v26  ;;  %v423_v26 = vmax.f32 %v359_v54, %v391_v15  ;;  %v395_v54 = vmul.f32 0.01, %v363_v37  ;;  %p1488_p7 = pnand %p1487_p3, %p1481_p8 }
  0x89   : > { %v393_v41 = vmul.f32 0.01, %v361_v22 }
  0x8a   : > { %v445_v53 = vpack.c.bf16 %v424_v29, %v423_v26  ;;  %v427_v2 = vmax.f32 %v363_v37, %v395_v54 }
  0x8b   : > { %v425_v58 = vmax.f32 %v361_v22, %v393_v41  ;;  %v1417_v22 = vld [vmem:[#allocation5 + $0x68] sm:$0xff]  }
  0x8c   : > { %v447_v18 = vpack.c.bf16 %v428_v12, %v427_v2  ;;  %1303 = vmatprep.subr.bf16.mxu1 %v1417_v22 }
  0x8d   : > { %v446_v15 = vpack.c.bf16 %v426_v60, %v425_v58  ;;  %1304 = vmatpush3.bf16.msra.mxu1 %v1417_v22 }
  0x8f   : > { %1274 = vmatmul.mubr.bf16.gmra.mrb[12].mxu0 %v442_v52  ;;  %v365_v52 = vadd.f32 %v1762_v9, %v326_v46  ;;  %v1418_v9 = vld [vmem:[#allocation5 + $0x70] sm:$0xff]  }
  0x90   : > { %1277 = vmatprep.mubr.bf16.mxu0 %v443_v7  ;;  %v398_v7 = vmul.f32 0.01, %v366_v1  ;;  %1305 = vmatprep.subr.bf16.mxu1 %v1418_v9 }
  0x91   : > { %v397_v3 = vmul.f32 0.01, %v365_v52  ;;  %1306 = vmatpush3.bf16.msra.mxu1 %v1418_v9 }
  0x92   : > { %v430_v6 = vmax.f32 %v366_v1, %v398_v7  ;;  %1307 = vmatprep.subr.bf16.mxu1 %v1419_v23 }
  0x93   : > { %v429_v19 = vmax.f32 %v365_v52, %v397_v3 }
  0x95   : > { %v448_v21 = vpack.c.bf16 %v430_v6, %v429_v19  ;;  %1308 = vmatpush3.bf16.msra.mxu1 %v1419_v23 }
  0x97   : > { %1278 = vmatmul.mubr.bf16.gmra.mrb[16].mxu0 %v444_v44 }
  0x98   : > { %1281 = vmatprep.mubr.bf16.mxu0 %v445_v53 }
  0x9f   : > { %1282 = vmatmul.mubr.bf16.gmra.mrb[20].mxu0 %v446_v15 }
  0xa0   : > { %1285 = vmatprep.mubr.bf16.mxu0 %v447_v18 }
  0xa7   : > { %1286 = vmatmul.mubr.bf16.gmra.mrb[24].mxu0 %v448_v21 }
  0xa8   : > { %1289 = vmatprep.mubr.bf16.mxu0 %v1913_v43 }
  0xaf   : > { %1290 = vmatmul.mubr.bf16.gmra.mrb[28].mxu0 %v450_v56 }
 0x14a   : > { %v1263_v25 = vpop.f32.mrb[0].mxu0 }
 0x14b   : > { %v565_v26 = vadd.f32 %v1263_v25, %v1960_v24  ;;  %v556_v29 = vpop.f32.mrb[1].mxu0 }
 0x14c   : > { %v557_v43 = vadd.f32 %v1960_v24, %v556_v29  ;;  %v1264_v56 = vpop.f32.mrb[2].mxu0 }
 0x14d   : > { %v685_v37 = vmul.f32 0.01, %v565_v26  ;;  %v568_v38 = vadd.f32 %v1264_v56, %v1960_v24  ;;  %v559_v41 = vpop.f32.mrb[3].mxu0 }
 0x14e   : > { %v683_v44 = vmul.f32 0.01, %v557_v43  ;;  %v560_v45 = vadd.f32 %v1960_v24, %v559_v41 }
 0x14f   : > { %v686_v46 = vmul.f32 0.01, %v568_v38  ;;  %v717_v53 = vmax.f32 %v565_v26, %v685_v37 }
 0x150   : > { %v684_v48 = vmul.f32 0.01, %v560_v45  ;;  %v715_v58 = vmax.f32 %v557_v43, %v683_v44 }
 0x151   : > { %v718_v54 = vmax.f32 %v568_v38, %v686_v46 }
 0x152   : > { %v1267_v57 = vpop.f32.mrb[4].mxu0  ;;  %v716_v60 = vmax.f32 %v560_v45, %v684_v48 }
 0x153   : > { %v581_v52 = vadd.f32 %v1267_v57, %v1960_v24  ;;  %v572_v1 = vpop.f32.mrb[5].mxu0  ;;  %v748_v2 = vpack.c.bf16 %v718_v54, %v717_v53 }
 0x154   : > { %v573_v12 = vadd.f32 %v1960_v24, %v572_v1  ;;  %v1268_v15 = vpop.f32.mrb[6].mxu0  ;;  %v747_v3 = vpack.c.bf16 %v716_v60, %v715_v58 }
 0x155   : > { %v689_v7 = vmul.f32 0.01, %v581_v52  ;;  %v584_v18 = vadd.f32 %v1268_v15, %v1960_v24  ;;  %v575_v19 = vpop.f32.mrb[7].mxu0 }
 0x156   : > { %v687_v6 = vmul.f32 0.01, %v573_v12  ;;  %v576_v21 = vadd.f32 %v1960_v24, %v575_v19  ;;  %1309 = vmatprep.mubr.bf16.mxu1 %v747_v3 }
 0x157   : > { %v690_v22 = vmul.f32 0.01, %v584_v18  ;;  %1310 = vmatmul.mubr.bf16.vlgmr.msra.gmra.mrb[0].mxu1 %v748_v2  ;;  %v721_v23 = vmax.f32 %v581_v52, %v689_v7 }
 0x158   : > { %v688_v9 = vmul.f32 0.01, %v576_v21  ;;  %v719_v26 = vmax.f32 %v573_v12, %v687_v6 }
 0x159   : > { %v722_v25 = vmax.f32 %v584_v18, %v690_v22 }
 0x15a   : > { %v720_v29 = vmax.f32 %v576_v21, %v688_v9  ;;  %v1271_v43 = vpop.f32.mrb[8].mxu0 }
 0x15b   : > { %v597_v56 = vadd.f32 %v1271_v43, %v1960_v24  ;;  %v588_v37 = vpop.f32.mrb[9].mxu0  ;;  %v750_v38 = vpack.c.bf16 %v722_v25, %v721_v23 }
 0x15c   : > { %v589_v41 = vadd.f32 %v1960_v24, %v588_v37  ;;  %v1272_v44 = vpop.f32.mrb[10].mxu0  ;;  %v749_v45 = vpack.c.bf16 %v720_v29, %v719_v26 }
 0x15d   : > { %v693_v46 = vmul.f32 0.01, %v597_v56  ;;  %v600_v48 = vadd.f32 %v1272_v44, %v1960_v24  ;;  %v591_v53 = vpop.f32.mrb[11].mxu0 }
 0x15e   : > { %v691_v54 = vmul.f32 0.01, %v589_v41  ;;  %v592_v57 = vadd.f32 %v1960_v24, %v591_v53  ;;  %1313 = vmatprep.mubr.bf16.mxu1 %v749_v45 }
 0x15f   : > { %v694_v58 = vmul.f32 0.01, %v600_v48  ;;  %1314 = vmatmul.mubr.bf16.gmra.mrb[4].mxu1 %v750_v38  ;;  %v725_v52 = vmax.f32 %v597_v56, %v693_v46 }
 0x160   : > { %v692_v60 = vmul.f32 0.01, %v592_v57  ;;  %v723_v2 = vmax.f32 %v589_v41, %v691_v54 }
 0x161   : > { %v726_v1 = vmax.f32 %v600_v48, %v694_v58 }
 0x162   : > { %v724_v12 = vmax.f32 %v592_v57, %v692_v60  ;;  %v1275_v15 = vpop.f32.mrb[12].mxu0 }
 0x163   : > { %v613_v3 = vadd.f32 %v1275_v15, %v1960_v24  ;;  %v604_v7 = vpop.f32.mrb[13].mxu0  ;;  %v752_v18 = vpack.c.bf16 %v726_v1, %v725_v52 }
 0x164   : > { %v605_v19 = vadd.f32 %v1960_v24, %v604_v7  ;;  %v1276_v6 = vpop.f32.mrb[14].mxu0  ;;  %v751_v21 = vpack.c.bf16 %v724_v12, %v723_v2 }
 0x165   : > { %v697_v22 = vmul.f32 0.01, %v613_v3  ;;  %v616_v9 = vadd.f32 %v1276_v6, %v1960_v24  ;;  %v607_v23 = vpop.f32.mrb[15].mxu0 }
 0x166   : > { %v695_v25 = vmul.f32 0.01, %v605_v19  ;;  %v608_v26 = vadd.f32 %v1960_v24, %v607_v23  ;;  %1317 = vmatprep.mubr.bf16.mxu1 %v751_v21 }
 0x167   : > { %v698_v29 = vmul.f32 0.01, %v616_v9  ;;  %1318 = vmatmul.mubr.bf16.gmra.mrb[8].mxu1 %v752_v18  ;;  %v729_v56 = vmax.f32 %v613_v3, %v697_v22 }
 0x168   : > { %v696_v43 = vmul.f32 0.01, %v608_v26  ;;  %v727_v38 = vmax.f32 %v605_v19, %v695_v25 }
 0x169   : > { %v730_v37 = vmax.f32 %v616_v9, %v698_v29 }
 0x16a   : > { %v728_v41 = vmax.f32 %v608_v26, %v696_v43  ;;  %v1279_v44 = vpop.f32.mrb[16].mxu0 }
 0x16b   : > { %v629_v45 = vadd.f32 %v1279_v44, %v1960_v24  ;;  %v620_v46 = vpop.f32.mrb[17].mxu0  ;;  %v754_v48 = vpack.c.bf16 %v730_v37, %v729_v56 }
 0x16c   : > { %v621_v53 = vadd.f32 %v1960_v24, %v620_v46  ;;  %v1280_v54 = vpop.f32.mrb[18].mxu0  ;;  %v753_v57 = vpack.c.bf16 %v728_v41, %v727_v38 }
 0x16d   : > { %v701_v58 = vmul.f32 0.01, %v629_v45  ;;  %v632_v60 = vadd.f32 %v1280_v54, %v1960_v24  ;;  %v623_v52 = vpop.f32.mrb[19].mxu0 }
 0x16e   : > { %v699_v1 = vmul.f32 0.01, %v621_v53  ;;  %v624_v2 = vadd.f32 %v1960_v24, %v623_v52  ;;  %1321 = vmatprep.mubr.bf16.mxu1 %v753_v57 }
 0x16f   : > { %v702_v12 = vmul.f32 0.01, %v632_v60  ;;  %1322 = vmatmul.mubr.bf16.gmra.mrb[12].mxu1 %v754_v48  ;;  %v733_v3 = vmax.f32 %v629_v45, %v701_v58 }
 0x170   : > { %v700_v15 = vmul.f32 0.01, %v624_v2  ;;  %v731_v18 = vmax.f32 %v621_v53, %v699_v1 }
 0x171   : > { %v734_v7 = vmax.f32 %v632_v60, %v702_v12 }
 0x172   : > { %v732_v19 = vmax.f32 %v624_v2, %v700_v15  ;;  %v1283_v6 = vpop.f32.mrb[20].mxu0 }
 0x173   : > { %v645_v21 = vadd.f32 %v1283_v6, %v1960_v24  ;;  %v636_v22 = vpop.f32.mrb[21].mxu0  ;;  %v756_v9 = vpack.c.bf16 %v734_v7, %v733_v3 }
 0x174   : > { %v637_v23 = vadd.f32 %v1960_v24, %v636_v22  ;;  %v1284_v25 = vpop.f32.mrb[22].mxu0  ;;  %v755_v26 = vpack.c.bf16 %v732_v19, %v731_v18 }
 0x175   : > { %v705_v29 = vmul.f32 0.01, %v645_v21  ;;  %v648_v43 = vadd.f32 %v1284_v25, %v1960_v24  ;;  %v639_v56 = vpop.f32.mrb[23].mxu0 }
 0x176   : > { %v703_v37 = vmul.f32 0.01, %v637_v23  ;;  %v640_v38 = vadd.f32 %v1960_v24, %v639_v56  ;;  %1325 = vmatprep.mubr.bf16.mxu1 %v755_v26 }
 0x177   : > { %v706_v41 = vmul.f32 0.01, %v648_v43  ;;  %1326 = vmatmul.mubr.bf16.gmra.mrb[16].mxu1 %v756_v9  ;;  %v737_v45 = vmax.f32 %v645_v21, %v705_v29 }
 0x178   : > { %v704_v44 = vmul.f32 0.01, %v640_v38  ;;  %v735_v48 = vmax.f32 %v637_v23, %v703_v37 }
 0x179   : > { %v738_v46 = vmax.f32 %v648_v43, %v706_v41 }
 0x17a   : > { %v736_v53 = vmax.f32 %v640_v38, %v704_v44  ;;  %v1287_v54 = vpop.f32.mrb[24].mxu0 }
 0x17b   : > { %v661_v57 = vadd.f32 %v1287_v54, %v1960_v24  ;;  %v652_v58 = vpop.f32.mrb[25].mxu0  ;;  %v758_v60 = vpack.c.bf16 %v738_v46, %v737_v45 }
 0x17c   : > { %v653_v52 = vadd.f32 %v1960_v24, %v652_v58  ;;  %v1288_v1 = vpop.f32.mrb[26].mxu0  ;;  %v757_v2 = vpack.c.bf16 %v736_v53, %v735_v48 }
 0x17d   : > { %v709_v12 = vmul.f32 0.01, %v661_v57  ;;  %v664_v15 = vadd.f32 %v1288_v1, %v1960_v24  ;;  %v655_v3 = vpop.f32.mrb[27].mxu0 }
 0x17e   : > { %v707_v7 = vmul.f32 0.01, %v653_v52  ;;  %v656_v18 = vadd.f32 %v1960_v24, %v655_v3  ;;  %1329 = vmatprep.mubr.bf16.mxu1 %v757_v2 }
 0x17f   : > { %v710_v19 = vmul.f32 0.01, %v664_v15  ;;  %1330 = vmatmul.mubr.bf16.gmra.mrb[20].mxu1 %v758_v60  ;;  %v741_v21 = vmax.f32 %v661_v57, %v709_v12  ;;  %v1997_v12 = vld [vmem:[%s2154_s4 + $0x1] ss:$0 sm:$0xff] }
 0x180   : > { %v708_v6 = vmul.f32 0.01, %v656_v18  ;;  %v739_v9 = vmax.f32 %v653_v52, %v707_v7 }
 0x181   : > { %v742_v22 = vmax.f32 %v664_v15, %v710_v19 }
 0x182   : > { %v740_v23 = vmax.f32 %v656_v18, %v708_v6  ;;  %v1291_v25 = vpop.f32.mrb[28].mxu0 }
 0x183   : > { %v677_v26 = vadd.f32 %v1291_v25, %v1960_v24  ;;  %v668_v29 = vpop.f32.mrb[29].mxu0  ;;  %v760_v43 = vpack.c.bf16 %v742_v22, %v741_v21 }
 0x184   : > { %v669_v56 = vadd.f32 %v1960_v24, %v668_v29  ;;  %v1292_v37 = vpop.f32.mrb[30].mxu0  ;;  %v759_v38 = vpack.c.bf16 %v740_v23, %v739_v9 }
 0x185   : > { %v713_v41 = vmul.f32 0.01, %v677_v26  ;;  %v680_v44 = vadd.f32 %v1292_v37, %v1960_v24  ;;  %v671_v45 = vpop.f32.mrb[31].mxu0 }
 0x186   : > { %v711_v46 = vmul.f32 0.01, %v669_v56  ;;  %v672_v48 = vadd.f32 %v1960_v24, %v671_v45  ;;  %1333 = vmatprep.mubr.bf16.mxu1 %v759_v38 }
 0x187   : > { %v714_v53 = vmul.f32 0.01, %v680_v44  ;;  %1334 = vmatmul.mubr.bf16.gmra.mrb[24].mxu1 %v760_v43  ;;  %v745_v57 = vmax.f32 %v677_v26, %v713_v41 }
 0x188   : > { %v712_v54 = vmul.f32 0.01, %v672_v48  ;;  %v743_v60 = vmax.f32 %v669_v56, %v711_v46 }
 0x189   : > { %v746_v58 = vmax.f32 %v680_v44, %v714_v53 }
 0x18a   : > { %v744_v52 = vmax.f32 %v672_v48, %v712_v54 }
 0x18b   : > { %v762_v1 = vpack.c.bf16 %v746_v58, %v745_v57 }
 0x18c   : > { %v761_v2 = vpack.c.bf16 %v744_v52, %v743_v60 }
 0x18e   : > { %1337 = vmatprep.mubr.bf16.mxu1 %v761_v2 }
 0x18f   : > { %1338 = vmatmul.mubr.bf16.gmra.mrb[28].mxu1 %v762_v1 }
 0x22a   : > { %v1311_v15 = vpop.f32.mrb[0].mxu1 }
 0x22b   : > { %v879_v24 = vadd.f32 %v1311_v15, %v1997_v12  ;;  %v870_v3 = vpop.f32.mrb[1].mxu1 }
 0x22c   : > { %v871_v7 = vadd.f32 %v1997_v12, %v870_v3  ;;  %v1312_v18 = vpop.f32.mrb[2].mxu1 }
 0x22d   : > { %v999_v19 = vadd.f32 %v879_v24, %v1765_v10  ;;  %v882_v6 = vadd.f32 %v1312_v18, %v1997_v12  ;;  %v873_v21 = vpop.f32.mrb[3].mxu1 }
 0x22e   : > { %v997_v22 = vadd.f32 %v871_v7, %v1745_v4  ;;  %v874_v9 = vadd.f32 %v1997_v12, %v873_v21 }
 0x22f   : > { %1031 = vst [vmem:[%s2007_s13 + $0x10] sm:$0xff] %v999_v19  ;;  %v1000_v23 = vadd.f32 %v882_v6, %v1768_v11 }
 0x230   : > { %1029 = vst [vmem:[%s2007_s13] sm:$0xff] %v997_v22  ;;  %v998_v10 = vadd.f32 %v874_v9, %v1748_v5 }
 0x231   : > { %1032 = vst [vmem:[%s2007_s13 + $0x18] sm:$0xff] %v1000_v23 }
 0x232   : > { %1030 = vst [vmem:[%s2007_s13 + $0x8] sm:$0xff] %v998_v10  ;;  %v1315_v4 = vpop.f32.mrb[4].mxu1 }
 0x233   : > { %v895_v25 = vadd.f32 %v1315_v4, %v1997_v12  ;;  %v886_v26 = vpop.f32.mrb[5].mxu1 }
 0x234   : > { %v887_v29 = vadd.f32 %v1997_v12, %v886_v26  ;;  %v1316_v43 = vpop.f32.mrb[6].mxu1 }
 0x235   : > { %v1003_v56 = vadd.f32 %v895_v25, %v1790_v30  ;;  %v898_v37 = vadd.f32 %v1316_v43, %v1997_v12  ;;  %v889_v11 = vpop.f32.mrb[7].mxu1 }
 0x236   : > { %v1001_v38 = vadd.f32 %v887_v29, %v1773_v14  ;;  %v890_v5 = vadd.f32 %v1997_v12, %v889_v11 }
 0x237   : > { %1035 = vst [vmem:[%s2007_s13 + $0x30] sm:$0xff] %v1003_v56  ;;  %v1004_v41 = vadd.f32 %v898_v37, %v1794_v33 }
 0x238   : > { %1033 = vst [vmem:[%s2007_s13 + $0x20] sm:$0xff] %v1001_v38  ;;  %v1002_v44 = vadd.f32 %v890_v5, %v1778_v17 }
 0x239   : > { %1036 = vst [vmem:[%s2007_s13 + $0x38] sm:$0xff] %v1004_v41 }
 0x23a   : > { %1034 = vst [vmem:[%s2007_s13 + $0x28] sm:$0xff] %v1002_v44  ;;  %v1319_v30 = vpop.f32.mrb[8].mxu1 }
 0x23b   : > { %v911_v45 = vadd.f32 %v1319_v30, %v1997_v12  ;;  %v902_v46 = vpop.f32.mrb[9].mxu1 }
 0x23c   : > { %v903_v14 = vadd.f32 %v1997_v12, %v902_v46  ;;  %v1320_v48 = vpop.f32.mrb[10].mxu1 }
 0x23d   : > { %v1007_v53 = vadd.f32 %v911_v45, %v1811_v47  ;;  %v914_v54 = vadd.f32 %v1320_v48, %v1997_v12  ;;  %v905_v33 = vpop.f32.mrb[11].mxu1 }
 0x23e   : > { %v1005_v57 = vadd.f32 %v903_v14, %v1797_v35  ;;  %v906_v17 = vadd.f32 %v1997_v12, %v905_v33 }
 0x23f   : > { %1039 = vst [vmem:[%s2007_s13 + $0x50] sm:$0xff] %v1007_v53  ;;  %v1008_v58 = vadd.f32 %v914_v54, %v1815_v49 }
 0x240   : > { %1037 = vst [vmem:[%s2007_s13 + $0x40] sm:$0xff] %v1005_v57  ;;  %v1006_v60 = vadd.f32 %v906_v17, %v1800_v36 }
 0x241   : > { %1040 = vst [vmem:[%s2007_s13 + $0x58] sm:$0xff] %v1008_v58 }
 0x242   : > { %1038 = vst [vmem:[%s2007_s13 + $0x48] sm:$0xff] %v1006_v60  ;;  %v1323_v47 = vpop.f32.mrb[12].mxu1 }
 0x243   : > { %v927_v52 = vadd.f32 %v1323_v47, %v1997_v12  ;;  %v918_v1 = vpop.f32.mrb[13].mxu1 }
 0x244   : > { %v919_v35 = vadd.f32 %v1997_v12, %v918_v1  ;;  %v1324_v2 = vpop.f32.mrb[14].mxu1 }
 0x245   : > { %v1011_v15 = vadd.f32 %v927_v52, %v1835_v13  ;;  %v930_v24 = vadd.f32 %v1324_v2, %v1997_v12  ;;  %v921_v49 = vpop.f32.mrb[15].mxu1 }
 0x246   : > { %v1009_v3 = vadd.f32 %v919_v35, %v1818_v50  ;;  %v922_v36 = vadd.f32 %v1997_v12, %v921_v49 }
 0x247   : > { %1043 = vst [vmem:[%s2007_s13 + $0x70] sm:$0xff] %v1011_v15  ;;  %v1012_v7 = vadd.f32 %v930_v24, %v1843_v20 }
 0x248   : > { %1041 = vst [vmem:[%s2007_s13 + $0x60] sm:$0xff] %v1009_v3  ;;  %v1010_v18 = vadd.f32 %v922_v36, %v1824_v59 }
 0x249   : > { %1044 = vst [vmem:[%s2007_s13 + $0x78] sm:$0xff] %v1012_v7 }
 0x24a   : > { %1042 = vst [vmem:[%s2007_s13 + $0x68] sm:$0xff] %v1010_v18  ;;  %v1327_v13 = vpop.f32.mrb[16].mxu1 }
 0x24b   : > { %v943_v19 = vadd.f32 %v1327_v13, %v1997_v12  ;;  %v934_v6 = vpop.f32.mrb[17].mxu1 }
 0x24c   : > { %v935_v50 = vadd.f32 %v1997_v12, %v934_v6  ;;  %v1328_v21 = vpop.f32.mrb[18].mxu1 }
 0x24d   : > { %v1015_v22 = vadd.f32 %v943_v19, %v1887_v61  ;;  %v946_v9 = vadd.f32 %v1328_v21, %v1997_v12  ;;  %v937_v20 = vpop.f32.mrb[19].mxu1 }
 0x24e   : > { %v1013_v23 = vadd.f32 %v935_v50, %v1849_v27  ;;  %v938_v59 = vadd.f32 %v1997_v12, %v937_v20 }
 0x24f   : > { %1047 = vst [vmem:[%s2007_s13 + $0x90] sm:$0xff] %v1015_v22  ;;  %v1016_v10 = vadd.f32 %v946_v9, %v1890_v62 }
 0x250   : > { %1045 = vst [vmem:[%s2007_s13 + $0x80] sm:$0xff] %v1013_v23  ;;  %v1014_v4 = vadd.f32 %v938_v59, %v1857_v31 }
 0x251   : > { %1048 = vst [vmem:[%s2007_s13 + $0x98] sm:$0xff] %v1016_v10 }
 0x252   : > { %1046 = vst [vmem:[%s2007_s13 + $0x88] sm:$0xff] %v1014_v4  ;;  %v1331_v61 = vpop.f32.mrb[20].mxu1 }
 0x253   : > { %v959_v25 = vadd.f32 %v1331_v61, %v1997_v12  ;;  %v950_v26 = vpop.f32.mrb[21].mxu1 }
 0x254   : > { %v951_v27 = vadd.f32 %v1997_v12, %v950_v26  ;;  %v1332_v29 = vpop.f32.mrb[22].mxu1 }
 0x255   : > { %v1019_v43 = vadd.f32 %v959_v25, %v1920_v55  ;;  %v962_v56 = vadd.f32 %v1332_v29, %v1997_v12  ;;  %v953_v62 = vpop.f32.mrb[23].mxu1 }
 0x256   : > { %v1017_v37 = vadd.f32 %v951_v27, %v1899_v8  ;;  %v954_v31 = vadd.f32 %v1997_v12, %v953_v62 }
 0x257   : > { %1051 = vst [vmem:[%s2007_s13 + $0xb0] sm:$0xff] %v1019_v43  ;;  %v1020_v11 = vadd.f32 %v962_v56, %v1924_v63 }
 0x258   : > { %1049 = vst [vmem:[%s2007_s13 + $0xa0] sm:$0xff] %v1017_v37  ;;  %v1018_v38 = vadd.f32 %v954_v31, %v1902_v16 }
 0x259   : > { %1052 = vst [vmem:[%s2007_s13 + $0xb8] sm:$0xff] %v1020_v11 }
 0x25a   : > { %1050 = vst [vmem:[%s2007_s13 + $0xa8] sm:$0xff] %v1018_v38  ;;  %v1335_v55 = vpop.f32.mrb[24].mxu1 }
 0x25b   : > { %v975_v5 = vadd.f32 %v1335_v55, %v1997_v12  ;;  %v966_v41 = vpop.f32.mrb[25].mxu1 }
 0x25c   : > { %v967_v8 = vadd.f32 %v1997_v12, %v966_v41  ;;  %v1336_v44 = vpop.f32.mrb[26].mxu1 }
 0x25d   : > { %v1023_v30 = vadd.f32 %v975_v5, %v1945_v39  ;;  %v978_v63 = vadd.f32 %v1336_v44, %v1997_v12  ;;  %v969_v45 = vpop.f32.mrb[27].mxu1 }
 0x25e   : > { %v1021_v16 = vadd.f32 %v967_v8, %v1927_v0  ;;  %v970_v46 = vadd.f32 %v1997_v12, %v969_v45 }
 0x25f   : > { %1055 = vst [vmem:[%s2007_s13 + $0xd0] sm:$0xff] %v1023_v30  ;;  %v1024_v14 = vadd.f32 %v978_v63, %v1948_v40 }
 0x260   : > { %1053 = vst [vmem:[%s2007_s13 + $0xc0] sm:$0xff] %v1021_v16  ;;  %v1022_v48 = vadd.f32 %v970_v46, %v1930_v42 }
 0x261   : > { %1056 = vst [vmem:[%s2007_s13 + $0xd8] sm:$0xff] %v1024_v14 }
 0x262   : > { %1054 = vst [vmem:[%s2007_s13 + $0xc8] sm:$0xff] %v1022_v48  ;;  %v1339_v53 = vpop.f32.mrb[28].mxu1 }
 0x263   : > { %v991_v39 = vadd.f32 %v1339_v53, %v1997_v12  ;;  %v982_v54 = vpop.f32.mrb[29].mxu1 }
 0x264   : > { %v983_v33 = vadd.f32 %v1997_v12, %v982_v54  ;;  %v1340_v0 = vpop.f32.mrb[30].mxu1 }
 0x265   : > { %v1027_v40 = vadd.f32 %v991_v39, %v1863_v34  ;;  %v994_v42 = vadd.f32 %v1340_v0, %v1997_v12  ;;  %v985_v57 = vpop.f32.mrb[31].mxu1 }
 0x266   : > { %v1025_v17 = vadd.f32 %v983_v33, %v1852_v28  ;;  %v986_v58 = vadd.f32 %v1997_v12, %v985_v57 }
 0x267   : > { %1059 = vst [vmem:[%s2007_s13 + $0xf0] sm:$0xff] %v1027_v40  ;;  %v1028_v60 = vadd.f32 %v994_v42, %v1878_v51 }
 0x268   : > { %1057 = vst [vmem:[%s2007_s13 + $0xe0] sm:$0xff] %v1025_v17  ;;  %v1026_v34 = vadd.f32 %v986_v58, %v1860_v32 }
 0x269   : > { %1060 = vst [vmem:[%s2007_s13 + $0xf8] sm:$0xff] %v1028_v60 }
 0x26a   : > { %1058 = vst [vmem:[%s2007_s13 + $0xe8] sm:$0xff] %v1026_v34 }
 0x26b   : > { %1491 = shalt.err (!%p1488_p7)
}
 0x26c   : > { %s1492_s6 = scalar_lea.hbm %s2100_s11, 4096  ;;  %s1496_s10 = scalar_lea.hbm %s2155_s5, 8192 }
 0x26d   : > { %p1493_p9 = scmp.ne.s32.totalorder %s2100_s11, %s1492_s6  ;;  %p1497_p5 = scmp.lt.u32.totalorder %s2100_s11, %s2155_s5 }
 0x26e   : > { %p1498_p11 = scmp.lt.u32.totalorder %s1496_s10, %s1492_s6  ;;  %p1500_p4 = scmp.lt.u32.totalorder %s1492_s6, %s2100_s11 }
 0x26f   : > { %p1494_p2 = pnand %p1493_p9, %p1680_p12 }
 0x270   : > { %p1499_p1 = por %p1498_p11, %p1497_p5 }
 0x271   : > { %p1495_p0 = pneg %p1494_p2 }
 0x272   : > { %p1501_p6 = por %p1500_p4, %p1499_p1 }
 0x274   : > { %p1502_p8 = pnand %p1501_p6, %p1495_p0 }
 0x276   : > { %1505 = shalt.err (!%p1502_p8)
}
 0x277   : > { %s1557_s28 = smov 128   ;;  %s1558_s17 = smov 8  }
 0x278   : > { %1347 = dma.vmem_to_hbm [thread:$0]  (%p1680_p12), %s2102_s16, 4096, %s2100_s11, %s1062_s22, %s1557_s28, %s1557_s28, %s1558_s17  }
 0x279 PF: > { %s1090_s27 = sand.u32 1, %s1536_s18   ;;  %p2170_p10 = scmp.ne.s32.totalorder %s2160_s25, 0 }
 0x27a   : > { %p2171_p13 = scmp.ge.s32.totalorder %s1548_s21, 2  ;;  %s1091_s12 = scalar_lea.sflag [#allocation4], %s1090_s27 }
 0x27c   : > { %p1358_p3 = pnand %p2171_p13, %p2170_p10 }
 0x27e   : > { %1531 = dma.done.wait (!%p1358_p3), %s1091_s12, 4096  }
 0x27f   : > { %1533 = vsyncadd (!%p1358_p3), %s1091_s12, 4294963200  ;;  %p19_p7 = scmp.ge.s32.totalorder %s1645_s30, 4   ;;  %s2172_s18 = smov %s1540_s19 }
 0x280   : > { %s2173_s19 = smov %s1544_s20  ;;  %s2174_s20 = smov %s1676_s8 }
 0x281   : > { %s2175_s21 = smov %s1645_s30  ;;  %21 = sbr.rel (!%p19_p7) target bundleno = 6 (0x6), region = 91 }
 0x288   :  { %1096 = vsyncpa [#allocation3], 1 }
 0x289   :  { %1098 = vsyncpa [#allocation3 + $0x1], 1 }
 0x28a   :  { %1099 = vsyncpa [#allocation6], 1 }
 0x28b   :  { %1100 = vsyncpa [#allocation4], 1 }
 0x28c   :  { %1102 = vsyncpa [#allocation4 + $0x1], 1 }

</bundles_post_ra>
